<compile_context>
chip_gen: v7x
topology: tpu7x:2x2x1
jax: 0.10.0
libtpu: 0.0.40
codegen_flags: <defaults>
</compile_context>

<pallas_src>
import math
import jax
import jax.numpy as jnp
from jax.experimental import pallas as pl
from jax.experimental.pallas import tpu as pltpu


def _patch_embed_kernel(x_ref, w_ref, pe_ref, o_ref):
    # x_ref:  (TB, P, patch_len)   TB sequences' patches
    # w_ref:  (patch_len, d_model) value-embedding weight, already transposed
    # pe_ref: (P, d_model)         positional embedding (shared by every sequence)
    # o_ref:  (TB, P, d_model)
    tb, p, patch_len = x_ref.shape
    d_model = w_ref.shape[1]
    x2 = x_ref[...].reshape(tb * p, patch_len)                        # one big MXU matmul
    y = jnp.dot(x2, w_ref[...], preferred_element_type=jnp.float32)   # (TB*P, d_model)
    y = y.reshape(tb, p, d_model) + pe_ref[...]                       # broadcast PE add
    o_ref[...] = y.astype(o_ref.dtype)


def _build_pe(num_patches, d_model):
    """PositionalEmbedding table, first num_patches rows."""
    position = jnp.arange(num_patches, dtype=jnp.float32)[:, None]
    div_term = jnp.exp(jnp.arange(0, d_model, 2, dtype=jnp.float32)
                       * -(math.log(10000.0) / d_model))
    pe = jnp.zeros((num_patches, d_model), dtype=jnp.float32)
    pe = pe.at[:, 0::2].set(jnp.sin(position * div_term))
    pe = pe.at[:, 1::2].set(jnp.cos(position * div_term)[:, : d_model // 2])
    return pe


def _choose_tb(bn, num_patches, patch_len, d_model,
               vmem_block_budget=8 << 20, itemsize=4):
    """Sequences per grid step: fill ~8 MiB of double-buffered in+out blocks, cap at BN,
    and make sure the parallel grid axis has >= 2 steps (v7x has 2 TensorCores)."""
    per_seq = 2 * num_patches * (patch_len + d_model) * itemsize
    tb = max(1, min(bn, vmem_block_budget // per_seq))
    if bn >= 2 and pl.cdiv(bn, tb) < 2:
        tb = pl.cdiv(bn, 2)
    return int(tb)


def patch_embedding_pallas(x, weight, *, patch_len, stride, padding, d_model):
    """Forward of PatchEmbedding.

    x:      (B, n_vars, seq_len) float32
    weight: (d_model, patch_len) float32  (nn.Linear weight, bias=False)
    returns (out, n_vars) with out of shape (B * n_vars, num_patches, d_model)
    """
    B, n_vars, seq_len = x.shape

    # --- glue: ReplicationPad1d((0, padding)) ---
    x_pad = jnp.pad(x, ((0, 0), (0, 0), (0, padding)), mode="edge")
    L = seq_len + padding

    # --- glue: unfold(dimension=-1, size=patch_len, step=stride) ---
    num_patches = (L - patch_len) // stride + 1
    if stride == patch_len:
        # Non-overlapping patches: a plain reshape, no HBM gather / data duplication.
        patches = x_pad[:, :, : num_patches * patch_len].reshape(
            B, n_vars, num_patches, patch_len)
    else:
        # TODO(synk): for overlapping patches, fold the unfold into the kernel (load raw
        # (TB, L) blocks and window in VMEM) instead of materializing this HBM gather.
        starts = jnp.arange(num_patches) * stride
        idx = starts[:, None] + jnp.arange(patch_len)[None, :]
        patches = x_pad[:, :, idx]

    BN = B * n_vars
    patches = patches.reshape(BN, num_patches, patch_len).astype(jnp.float32)

    # --- glue: positional embedding table + transposed weight ---
    pe = _build_pe(num_patches, d_model)
    w_t = weight.T.astype(jnp.float32)                                # (patch_len, d_model)

    TB = _choose_tb(BN, num_patches, patch_len, d_model)
    grid = (pl.cdiv(BN, TB),)

    flops = 2 * BN * num_patches * patch_len * d_model
    bytes_accessed = 4 * (BN * num_patches * (patch_len + d_model)
                          + patch_len * d_model + num_patches * d_model)

    out = pl.pallas_call(
        _patch_embed_kernel,
        out_shape=jax.ShapeDtypeStruct((BN, num_patches, d_model), jnp.float32),
        grid_spec=pltpu.PrefetchScalarGridSpec(
            num_scalar_prefetch=0,
            grid=grid,
            in_specs=[
                pl.BlockSpec((TB, num_patches, patch_len), lambda i: (i, 0, 0)),
                # W and PE are grid-invariant (block index always (0, 0)) -> DMA'd once.
                pl.BlockSpec((patch_len, d_model), lambda i: (0, 0)),
                pl.BlockSpec((num_patches, d_model), lambda i: (0, 0)),
            ],
            out_specs=pl.BlockSpec((TB, num_patches, d_model), lambda i: (i, 0, 0)),
        ),
        compiler_params=pltpu.CompilerParams(
            dimension_semantics=("parallel",),
            vmem_limit_bytes=32 * 1024 * 1024,
        ),
        cost_estimate=pl.CostEstimate(
            flops=flops, transcendentals=0, bytes_accessed=bytes_accessed),
    )(patches, w_t, pe)

    # Dropout: identity at inference (nn.Dropout in eval mode).
    # TODO(synk): training-mode dropout mask not implemented (inference semantics only).
    return out, n_vars


def patch_embedding_ref(x, weight, *, patch_len, stride, padding, d_model):
    """Pure-JAX reference for verification."""
    B, n_vars, seq_len = x.shape
    x_pad = jnp.pad(x, ((0, 0), (0, 0), (0, padding)), mode="edge")
    L = seq_len + padding
    num_patches = (L - patch_len) // stride + 1
    starts = jnp.arange(num_patches) * stride
    idx = starts[:, None] + jnp.arange(patch_len)[None, :]
    patches = x_pad[:, :, idx].reshape(B * n_vars, num_patches, patch_len)
    y = jnp.einsum("bpl,dl->bpd", patches, weight)
    pe = _build_pe(num_patches, d_model)
    return y + pe[None], n_vars


if __name__ == "__main__":
    # Small, module-consistent shapes.
    B, n_vars, seq_len = 2, 4, 16
    d_model, patch_len, stride, padding = 32, 8, 8, 8   # dropout=0.0 (identity)

    key = jax.random.PRNGKey(0)
    kx, kw = jax.random.split(key)
    x = jax.random.normal(kx, (B, n_vars, seq_len), dtype=jnp.float32)
    # Deterministic init of nn.Linear(patch_len, d_model, bias=False) weight: (d_model, patch_len)
    bound = 1.0 / math.sqrt(patch_len)
    weight = jax.random.uniform(kw, (d_model, patch_len), minval=-bound, maxval=bound,
                                dtype=jnp.float32)

    out, nv = patch_embedding_pallas(x, weight, patch_len=patch_len, stride=stride,
                                     padding=padding, d_model=d_model)
    out = jax.block_until_ready(out)

    ref, _ = patch_embedding_ref(x, weight, patch_len=patch_len, stride=stride,
                                 padding=padding, d_model=d_model)
    num_patches = (seq_len + padding - patch_len) // stride + 1
    assert out.shape == (B * n_vars, num_patches, d_model)
    assert nv == n_vars
    assert jnp.allclose(out, ref, atol=1e-5, rtol=1e-5), "mismatch vs reference"

    print("KERNEL_OK")
</pallas_src>

<mosaic_0001>
module attributes {stable_mosaic.version = 11 : i64} {
  func.func @_patch_embed_kernel(%arg0: i32, %arg1: memref<4x3x8xf32, #tpu.memory_space<vmem>>, %arg2: memref<8x32xf32, #tpu.memory_space<vmem>>, %arg3: memref<3x32xf32, #tpu.memory_space<vmem>>, %arg4: memref<4x3x32xf32, #tpu.memory_space<vmem>>) attributes {dimension_semantics = [#tpu.dimension_semantics<parallel>], iteration_bounds = array<i64: 2>, scalar_prefetch = 0 : i64, scratch_operands = 0 : i64, tpu.core_type = #tpu.core_type<tc>, window_params = [{transform_indices = @transform_0, window_bounds = array<i64: 4, 3, 8>}, {pipeline_mode = #tpu.pipeline_mode<synchronous>, transform_indices = @transform_1, window_bounds = array<i64: 8, 32>}, {pipeline_mode = #tpu.pipeline_mode<synchronous>, transform_indices = @transform_2, window_bounds = array<i64: 3, 32>}, {transform_indices = @transform_3, window_bounds = array<i64: 4, 3, 32>}]} {
    %c0 = arith.constant 0 : index
    %c0_0 = arith.constant 0 : index
    %c0_1 = arith.constant 0 : index
    %0 = vector.load %arg1[%c0, %c0_0, %c0_1] : memref<4x3x8xf32, #tpu.memory_space<vmem>>, vector<4x3x8xf32>
    %1 = vector.shape_cast %0 : vector<4x3x8xf32> to vector<12x8xf32>
    %c0_2 = arith.constant 0 : index
    %c0_3 = arith.constant 0 : index
    %2 = vector.load %arg2[%c0_2, %c0_3] : memref<8x32xf32, #tpu.memory_space<vmem>>, vector<8x32xf32>
    %cst = arith.constant dense<0.000000e+00> : vector<12x32xf32>
    %3 = tpu.matmul %1, %2, %cst {dimension_numbers = #tpu.dot_dimension_numbers<[1], [0], [0], [1], [0, 0, 1, 1], [], []>} : vector<12x8xf32>, vector<8x32xf32>, vector<12x32xf32> -> vector<12x32xf32>
    %4 = vector.shape_cast %3 : vector<12x32xf32> to vector<4x3x32xf32>
    %c0_4 = arith.constant 0 : index
    %c0_5 = arith.constant 0 : index
    %5 = vector.load %arg3[%c0_4, %c0_5] : memref<3x32xf32, #tpu.memory_space<vmem>>, vector<3x32xf32>
    %6 = vector.shape_cast %5 : vector<3x32xf32> to vector<1x3x32xf32>
    %7 = vector.broadcast %6 : vector<1x3x32xf32> to vector<4x3x32xf32>
    %8 = arith.addf %4, %7 : vector<4x3x32xf32>
    %c0_6 = arith.constant 0 : index
    %c0_7 = arith.constant 0 : index
    %c0_8 = arith.constant 0 : index
    %9 = vector.load %arg4[%c0_6, %c0_7, %c0_8] : memref<4x3x32xf32, #tpu.memory_space<vmem>>, vector<4x3x32xf32>
    tpu.vector_store %arg4[%c0_6, %c0_7, %c0_8], %8 {strides = array<i32>} : memref<4x3x32xf32, #tpu.memory_space<vmem>>, vector<4x3x32xf32>,
    return
  }
  func.func @transform_0(%arg0: i32) -> (i32, i32, i32) {
    %c0_i32 = arith.constant 0 : i32
    %c0_i32_0 = arith.constant 0 : i32
    %c0_i32_1 = arith.constant 0 : i32
    return %arg0, %c0_i32, %c0_i32_0 : i32, i32, i32
  }
  func.func @transform_1(%arg0: i32) -> (i32, i32) {
    %c0_i32 = arith.constant 0 : i32
    %c0_i32_0 = arith.constant 0 : i32
    %c0_i32_1 = arith.constant 0 : i32
    return %c0_i32, %c0_i32_0 : i32, i32
  }
  func.func @transform_2(%arg0: i32) -> (i32, i32) {
    %c0_i32 = arith.constant 0 : i32
    %c0_i32_0 = arith.constant 0 : i32
    %c0_i32_1 = arith.constant 0 : i32
    return %c0_i32, %c0_i32_0 : i32, i32
  }
  func.func @transform_3(%arg0: i32) -> (i32, i32, i32) {
    %c0_i32 = arith.constant 0 : i32
    %c0_i32_0 = arith.constant 0 : i32
    %c0_i32_1 = arith.constant 0 : i32
    return %arg0, %c0_i32, %c0_i32_0 : i32, i32, i32
  }
}

</mosaic_0001>

<bundles_post_ra>
// kernel: tpu_custom_call.1
= control target key start
LH: loop header
LB: loop body
LE: loop exit
PB: predicated region body
PF: predicated region fallthrough
CT: control target
= control target key end

     0   :  { %s788_s12 = smov 0   ;;  %s860_s0 = inlined_call_operand.vmem [shape: f32[8,3,8], index: 0, kind: input, shape index: {}]   ;;  %s861_s1 = inlined_call_operand.vmem [shape: f32[8,32], index: 1, kind: input, shape index: {}]   ;;  %s862_s2 = inlined_call_operand.vmem [shape: f32[3,32], index: 2, kind: input, shape index: {}]   ;;  %s863_s3 = inlined_call_operand.vmem [shape: f32[8,3,32], index: 3, kind: output, shape index: {}]  }
   0x1 LB: > { %s724_s13 = sadd.s32 4294967295, %s765_s12   ;;  %p728_p0 = scmp.ge.s32.totalorder %s765_s12, 1  ;;  %s765_s12 = sphi %s788_s12, %s13_s12  }
   0x2   : > { %p138_p1 = scmp.lt.s32.totalorder %s765_s12, 3 }
   0x4   : > { %p139_p2 = pnand %p728_p0, %p138_p1 }
   0x5   : > { %v274_v0 = vld [vmem:[%s861_s1] sm:$0xff] (!%p139_p2)  ;;  %s729_s16 = sshll.u32 (!%p139_p2), %s724_s13, 2  ;;  %v193_v1 = vlaneseq (!%p139_p2)  ;;  %v767_v2 = vmov (!%p139_p2), 1966171168   ;;  %vm348_vm0 = vcmask (!%p139_p2), 64512   ;;  %vm663_vm1 = vcmask (!%p139_p2), 256000  }
   0x6   : > { %142 = sbr.rel (%p139_p2) target bundleno = 268 (0x10c), region = 32  ;;  %745 = vmatprep.subr.mxu0 (!%p139_p2), %v274_v0  ;;  %p163_p3 = scmp.lt.s32.totalorder (!%p139_p2), %s729_s16, 7  ;;  %v191_v3 = vunpack.c.l.s4 (!%p139_p2), %v767_v2  ;;  %v739_v46 = vld.sshfl [vmem:[%s862_s2] sm:$0x13 pattern:$0x75316420] (!%p139_p2) }
   0x7   : > { %746 = vmatpush3.msra.mxu0 (!%p139_p2), %v274_v0  ;;  %v194_v4 = vshrl.u32 (!%p139_p2), %v193_v1, 7  ;;  %v524_v47 = vcombine.high (!%p139_p2), %v739_v46, %v739_v46 }
   0x8   : > { %v192_v5 = vunpack.c.0.s8 (!%p139_p2), %v191_v3 }
   0xa   : > { %v802_v6 = vsub.s32 (!%p139_p2), %v192_v5, %v194_v4 }
   0xc   : > { %v531_v55 = vrot.slane (!%p139_p2), %v739_v46, %v802_v6  ;;  %v538_v56 = vrot.slane (!%p139_p2), %v524_v47, %v802_v6 }
   0xd   : > { %s865_s16 = smov (!%p163_p3, %s729_s16), 7 }
   0xe   : > { %s730_s17 = sshll.u32 %s865_s16, 2  ;;  %v539_v3 = vcombine.high %v531_v55, %v531_v55 }
   0xf   : > { %s166_s20 = scalar_lea.vmem %s860_s0, %s730_s17  ;;  %s172_s25 = scalar_lea.vmem %s863_s3, %s730_s17 }
  0x10   : > { %v733_v7 = vld.sshfl [vmem:[%s166_s20] sm:$0x13 pattern:$0x75316420] }
  0x11   : > { %v734_v8 = vld.sshfl [vmem:[%s166_s20 + $0x4] sm:$0x13 pattern:$0x75316420]  ;;  %v189_v9 = vcombine.high %v733_v7, %v733_v7  ;;  %v196_v10 = vrot.slane %v733_v7, %v802_v6 }
  0x12   : > { %v735_v11 = vld.sshfl [vmem:[%s166_s20 + $0x8] sm:$0x13 pattern:$0x75316420]  ;;  %v212_v12 = vcombine.high %v734_v8, %v734_v8  ;;  %v219_v13 = vrot.slane %v734_v8, %v802_v6 }
  0x13   : > { %v203_v14 = vrot.slane %v189_v9, %v802_v6  ;;  %v204_v15 = vcombine.high %v196_v10, %v196_v10  ;;  %v235_v16 = vcombine.high %v735_v11, %v735_v11  ;;  %v242_v17 = vrot.slane %v735_v11, %v802_v6  ;;  %v736_v18 = vld.sshfl [vmem:[%s166_s20 + $0xc] sm:$0x13 pattern:$0x75316420] }
  0x14   : > { %v226_v19 = vrot.slane %v212_v12, %v802_v6  ;;  %v227_v20 = vcombine.high %v219_v13, %v219_v13  ;;  %v258_v21 = vcombine.high %v736_v18, %v736_v18  ;;  %v265_v22 = vrot.slane %v736_v18, %v802_v6 }
  0x15   : > { %v249_v23 = vrot.slane %v235_v16, %v802_v6  ;;  %v250_v24 = vcombine.high %v242_v17, %v242_v17  ;;  %v275_v25 = vcombine.low %v196_v10, %v203_v14  ;;  %v276_v26 = vcombine.low %v204_v15, %v219_v13 }
  0x16   : > { %v277_v27 = vcombine.low %v226_v19, %v227_v20  ;;  %v272_v28 = vrot.slane %v258_v21, %v802_v6  ;;  %v273_v29 = vcombine.high %v265_v22, %v265_v22 }
  0x17   : > { %v278_v30 = vcombine.low %v242_v17, %v249_v23  ;;  %v285_v31 = vrot.slane %v275_v25, %v802_v6  ;;  %v292_v32 = vrot.slane %v276_v26, %v802_v6  ;;  %v324_v33 = vcombine.low %v250_v24, %v265_v22 }
  0x18   : > { %v299_v34 = vrot.slane %v277_v27, %v802_v6  ;;  %v325_v35 = vcombine.low %v272_v28, %v273_v29 }
  0x19   : > { %v306_v36 = vrot.slane %v278_v30, %v802_v6  ;;  %v307_v37 = vcombine.low %v285_v31, %v292_v32  ;;  %v332_v38 = vrot.slane %v324_v33, %v802_v6 }
  0x1a   : > { %v339_v39 = vrot.slane %v325_v35, %v802_v6 }
  0x1b   : > { %v308_v40 = vcombine.low %v299_v34, %v306_v36  ;;  %v315_v41 = vrot.slane %v307_v37, %v802_v6 }
  0x1c   : > { %v340_v42 = vcombine.low %v332_v38, %v339_v39 }
  0x1d   : > { %v322_v43 = vrot.slane %v308_v40, %v802_v6 }
  0x1e   : > { %v347_v44 = vrot.slane %v340_v42, %v802_v6 }
  0x1f   : > { %v323_v45 = vcombine.low %v315_v41, %v322_v43 }
  0x21   : > { %747 = vmatprep.mubr.msk.f32.mxu0 %vm348_vm0, %v323_v45 }
  0x22   : > { %748 = vmatmul.mubr.msk.f32.vlgmr.msra.gmra.mrb[0].mxu0 %vm348_vm0, %v347_v44 }
  0xf5   : > { %v749_v48 = vpop.f32.mrb[0].mxu0 }
  0xf6   : > { %v485_v49 = vrot.slane %v749_v48, %v802_v6  ;;  %v419_v50 = vpop.f32.mrb[1].mxu0 }
  0xf7   : > { %v430_v51 = vcombine.high %v419_v50, %v419_v50  ;;  %v437_v52 = vrot.slane %v419_v50, %v802_v6 }
  0xf8   : > { %v486_v53 = vcombine.high %v485_v49, %v485_v49  ;;  %v493_v54 = vrot.slane %v485_v49, %v802_v6 }
  0xf9   : > { %v444_v57 = vrot.slane %v430_v51, %v802_v6  ;;  %v445_v58 = vcombine.high %v437_v52, %v437_v52  ;;  %v453_v59 = vrot.slane %v437_v52, %v802_v6 }
  0xfa   : > { %v500_v60 = vrot.slane %v486_v53, %v802_v6  ;;  %v501_v61 = vcombine.high %v493_v54, %v493_v54  ;;  %v551_v20 = vadd.f32 %v539_v3, %v493_v54 }
  0xfb   : > { %v446_v62 = vcombine.high %v444_v57, %v444_v57  ;;  %v460_v63 = vrot.slane %v444_v57, %v802_v6  ;;  %v467_v0 = vrot.slane %v445_v58, %v802_v6  ;;  %v475_v1 = vcombine.high %v453_v59, %v453_v59 }
  0xfc   : > { %v502_v2 = vcombine.high %v500_v60, %v500_v60  ;;  %v552_v4 = vadd.f32 %v531_v55, %v500_v60  ;;  %v553_v5 = vadd.f32 %v538_v56, %v501_v61  ;;  %v543_v10 = vadd.f32 %v531_v55, %v453_v59 }
  0xfd   : > { %v474_v7 = vrot.slane %v446_v62, %v802_v6  ;;  %v476_v8 = vcombine.high %v460_v63, %v460_v63  ;;  %v477_v9 = vcombine.high %v467_v0, %v467_v0  ;;  %v544_v13 = vadd.f32 %v538_v56, %v467_v0 }
  0xfe   : > { %v554_v11 = vadd.f32 %v539_v3, %v502_v2  ;;  %v636_v12 = vcombine.low %v552_v4, %v553_v5  ;;  %v545_v14 = vadd.f32 %v539_v3, %v475_v1  ;;  %v547_v17 = vadd.f32 %v538_v56, %v460_v63 }
  0xff   : > { %v478_v15 = vcombine.high %v474_v7, %v474_v7  ;;  %v546_v16 = vadd.f32 %v531_v55, %v477_v9  ;;  %v548_v18 = vadd.f32 %v539_v3, %v474_v7  ;;  %v567_v19 = vcombine.low %v543_v10, %v544_v13 }
 0x100   : > { %v549_v21 = vadd.f32 %v531_v55, %v476_v8  ;;  %v643_v24 = vrot.slane %v636_v12, %v802_v6  ;;  %v650_v25 = vrot.slane %v554_v11, %v802_v6  ;;  %v581_v27 = vrot.slane %v545_v14, %v802_v6 }
 0x101   : > { %v550_v22 = vadd.f32 %v538_v56, %v478_v15  ;;  %v590_v23 = vcombine.low %v546_v16, %v547_v17  ;;  %v574_v26 = vrot.slane %v567_v19, %v802_v6  ;;  %v604_v29 = vrot.slane %v548_v18, %v802_v6 }
 0x102   : > { %v627_v32 = vrot.slane %v551_v20, %v802_v6  ;;  %v651_v35 = vcombine.low %v643_v24, %v650_v25 }
 0x103   : > { %v597_v28 = vrot.slane %v590_v23, %v802_v6  ;;  %v613_v30 = vcombine.low %v549_v21, %v550_v22  ;;  %v582_v31 = vcombine.low %v574_v26, %v581_v27 }
 0x104   : > { %v658_v40 = vrot.slane %v651_v35, %v802_v6 }
 0x105   : > { %v605_v33 = vcombine.low %v597_v28, %v604_v29  ;;  %v620_v34 = vrot.slane %v613_v30, %v802_v6  ;;  %v589_v36 = vrot.slane %v582_v31, %v802_v6 }
 0x106   : > { %667 = vst.msk [vmem:[%s172_s25 + $0xc] sm:$0x7] %vm663_vm1, %v658_v40 }
 0x107   : > { %v612_v37 = vrot.slane %v605_v33, %v802_v6  ;;  %v628_v38 = vcombine.low %v620_v34, %v627_v32  ;;  %664 = vst.msk [vmem:[%s172_s25] sm:$0x7] %vm663_vm1, %v589_v36 }
 0x109   : > { %v635_v39 = vrot.slane %v628_v38, %v802_v6  ;;  %665 = vst.msk [vmem:[%s172_s25 + $0x4] sm:$0x7] %vm663_vm1, %v612_v37 }
 0x10b   : > { %666 = vst.msk [vmem:[%s172_s25 + $0x8] sm:$0x7] %vm663_vm1, %v635_v39 }
 0x10c PF: > { %s13_s12 = sadd.s32 1, %s765_s12  }
 0x10d   : > { %p10_p4 = scmp.ge.s32.totalorder %s13_s12, 4  }
 0x10f   :  { %12 = sbr.rel (!%p10_p4) target bundleno = 1 (0x1), region = 62 }

</bundles_post_ra>
